<compile_context>
chip_gen: v7x
topology: tpu7x:2x2x1
jax: 0.10.0
libtpu: 0.0.40
codegen_flags: <defaults>
</compile_context>

<pallas_src>
import jax
import jax.numpy as jnp
from jax.experimental import pallas as pl
from jax.experimental.pallas import tpu as pltpu

BN_EPS = 1e-5
COS_EPS = 1e-8

HIDDEN_PAD = 128   # 100 -> 128 lanes
OUTPUT_PAD = 512   # 500 -> 512 lanes
OUT_LANES = 128    # lane-dense output slab width


def matchnn_kernel(x1_ref, x2_ref, w1_ref, wo_ref, bias_ref, out_ref):
    """Full forward for both arms + cosine + hardtanh, fully resident in VMEM.

    x1_ref  : (B, 24)   f32   first arm inputs
    x2_ref  : (B, 24)   f32   second arm inputs
    w1_ref  : (24, 128) bf16  BN0-folded Linear(24->100) weight, zero-padded cols
    wo_ref  : (128,512) bf16  BN1-folded Linear(100->500) weight, zero-padded rows/cols
    bias_ref: (2, 512)  f32   row 0 = padded hidden bias b1', row 1 = padded output bias bo'
    out_ref : (B, 128)  f32   cosine broadcast across lanes (dense store)

    Assumes B is a multiple of 8 (sublane tile) so the (2,B,F) reshapes are tile-aligned.
    """
    B = x1_ref.shape[0]

    def norm_stats(x):
        # Training-mode BN statistics per arm; affine is folded into the next Linear.
        mean = jnp.mean(x, axis=0, keepdims=True)
        ex2 = jnp.mean(x * x, axis=0, keepdims=True)
        var = jnp.maximum(ex2 - mean * mean, 0.0)   # clamp: FP cancellation -> no NaN
        return mean, jax.lax.rsqrt(var + BN_EPS)

    x1 = x1_ref[...]
    x2 = x2_ref[...]
    m1, r1 = norm_stats(x1)
    m2, r2 = norm_stats(x2)
    # Fused (2B, 24) activation materialized only at the bf16 cast feeding the MXU.
    xn = jnp.concatenate([((x1 - m1) * r1).astype(jnp.bfloat16),
                          ((x2 - m2) * r2).astype(jnp.bfloat16)], axis=0)

    bias = bias_ref[...]
    b1 = bias[0:1, :HIDDEN_PAD]                               # (1, 128)
    bo = bias[1:2, :]                                         # (1, 512)

    # Fused Linear(24->128) for both arms: bf16 MXU operands, f32 accumulation.
    h = jnp.dot(xn, w1_ref[...], preferred_element_type=jnp.float32) + b1
    h = jnp.maximum(h, 0.0)                                   # ReLU, (2B, 128) f32

    # Per-arm BN stats for the hidden layer via (2, B, F) reshape + reduce(axis=1);
    # whole block normalized in place (no slice/concat copy chain).
    h3 = h.reshape(2, B, HIDDEN_PAD)
    mean = jnp.mean(h3, axis=1, keepdims=True)                # (2, 1, 128)
    ex2 = jnp.mean(h3 * h3, axis=1, keepdims=True)
    var = jnp.maximum(ex2 - mean * mean, 0.0)
    hn = ((h3 - mean) * jax.lax.rsqrt(var + BN_EPS)).astype(jnp.bfloat16)
    hn = hn.reshape(2 * B, HIDDEN_PAD)
    # Dropout(p=0.0) is the identity.

    # Fused Linear(128->512) for both arms.
    y = jnp.dot(hn, wo_ref[...], preferred_element_type=jnp.float32) + bo
    y3 = y.reshape(2, B, OUTPUT_PAD)
    y1 = y3[0]
    y2 = y3[1]

    # CosineSimilarity(dim=1, eps=1e-8): dot / max(||y1||*||y2||, eps).
    # sqrt(max(ss1*ss2, eps^2)) == max(||y1||*||y2||, eps) -> one fused rsqrt (EUP).
    dot = jnp.sum(y1 * y2, axis=-1, keepdims=True)            # (B, 1)
    ss1 = jnp.sum(y1 * y1, axis=-1, keepdims=True)
    ss2 = jnp.sum(y2 * y2, axis=-1, keepdims=True)
    cos = dot * jax.lax.rsqrt(jnp.maximum(ss1 * ss2, COS_EPS * COS_EPS))

    # Hardtanh(0, 1); broadcast across 128 lanes for an unmasked dense store.
    out_ref[...] = jnp.broadcast_to(jnp.clip(cos, 0.0, 1.0), out_ref.shape)


def make_params(key, input_size=24, hidden=100, output_size=500):
    """Unpadded f32 parameters mirroring MatchNN.__init__ (used by the reference).

    Linear weights: kaiming-normal (std = sqrt(2 / fan_in)), stored as (in, out)
    so y = x @ W + b.  Biases: PyTorch Linear default uniform(+-1/sqrt(fan_in)).
    BN: gamma = 1, beta = 0."""
    k1, k2, k3, k4 = jax.random.split(key, 4)
    w1 = jax.random.normal(k1, (input_size, hidden), jnp.float32) * jnp.sqrt(2.0 / input_size)
    b1 = jax.random.uniform(k2, (hidden,), jnp.float32,
                            -1.0 / jnp.sqrt(input_size), 1.0 / jnp.sqrt(input_size))
    wo = jax.random.normal(k3, (hidden, output_size), jnp.float32) * jnp.sqrt(2.0 / hidden)
    bo = jax.random.uniform(k4, (output_size,), jnp.float32,
                            -1.0 / jnp.sqrt(hidden), 1.0 / jnp.sqrt(hidden))
    return dict(
        w1=w1, b1=b1, wo=wo, bo=bo,
        bn0_g=jnp.ones((input_size,), jnp.float32),
        bn0_b=jnp.zeros((input_size,), jnp.float32),
        bn1_g=jnp.ones((hidden,), jnp.float32),
        bn1_b=jnp.zeros((hidden,), jnp.float32),
    )


def pack_params(p, hidden_pad=HIDDEN_PAD, output_pad=OUTPUT_PAD):
    """Fold BN affine into the following Linears, lane-pad, and pack into 3 operands."""
    input_size, hidden = p["w1"].shape
    output_size = p["wo"].shape[1]
    # BN-affine folding (f32).  Exact for fresh params (gamma=1, beta=0).
    w1f = p["bn0_g"][:, None] * p["w1"]                        # (24, 100)
    b1f = p["bn0_b"] @ p["w1"] + p["b1"]                       # (100,)
    wof = p["bn1_g"][:, None] * p["wo"]                        # (100, 500)
    bof = p["bn1_b"] @ p["wo"] + p["bo"]                       # (500,)
    hp = hidden_pad - hidden
    op = output_pad - output_size
    w1p = jnp.pad(w1f, ((0, 0), (0, hp))).astype(jnp.bfloat16)          # (24, 128)
    wop = jnp.pad(wof, ((0, hp), (0, op))).astype(jnp.bfloat16)         # (128, 512)
    bias = jnp.stack([jnp.pad(b1f, (0, output_pad - hidden)),
                      jnp.pad(bof, (0, op))], axis=0)                   # (2, 512) f32
    return dict(w1=w1p, wo=wop, bias=bias)


def matchnn_forward(x1, x2, kparams):
    B = x1.shape[0]
    vmem = pl.BlockSpec(memory_space=pltpu.MemorySpace.VMEM)
    out = pl.pallas_call(
        matchnn_kernel,
        out_shape=jax.ShapeDtypeStruct((B, OUT_LANES), jnp.float32),
        in_specs=[vmem] * 5,
        out_specs=vmem,
    )(x1, x2, kparams["w1"], kparams["wo"], kparams["bias"])
    return out[:, :1]                          # (B, 1), matching PyTorch reshape([-1, 1])


def matchnn_ref(x1, x2, p, matmul_dtype=jnp.float32):
    """Pure-JAX reference (unpadded, unfolded).  matmul_dtype matches the kernel's bf16 path."""
    def bn(x, g, b):
        m = jnp.mean(x, axis=0, keepdims=True)
        v = jnp.mean((x - m) ** 2, axis=0, keepdims=True)
        return (x - m) / jnp.sqrt(v + BN_EPS) * g + b

    def arm(x):
        x = bn(x, p["bn0_g"], p["bn0_b"])
        h = jnp.dot(x.astype(matmul_dtype), p["w1"].astype(matmul_dtype),
                    preferred_element_type=jnp.float32) + p["b1"]
        h = bn(jnp.maximum(h, 0.0), p["bn1_g"], p["bn1_b"])
        return jnp.dot(h.astype(matmul_dtype), p["wo"].astype(matmul_dtype),
                       preferred_element_type=jnp.float32) + p["bo"]

    y1, y2 = arm(x1), arm(x2)
    dot = jnp.sum(y1 * y2, axis=1, keepdims=True)
    n1 = jnp.linalg.norm(y1, axis=1, keepdims=True)
    n2 = jnp.linalg.norm(y2, axis=1, keepdims=True)
    return jnp.clip(dot / jnp.maximum(n1 * n2, COS_EPS), 0.0, 1.0)


if __name__ == "__main__":
    INPUT_SIZE, HIDDEN, OUTPUT_SIZE, BATCH = 24, 100, 500, 8

    key = jax.random.PRNGKey(0)
    kx1, kx2, kp = jax.random.split(key, 3)
    x1 = jax.random.normal(kx1, (BATCH, INPUT_SIZE), jnp.float32)
    x2 = jax.random.normal(kx2, (BATCH, INPUT_SIZE), jnp.float32)

    params = make_params(kp, INPUT_SIZE, HIDDEN, OUTPUT_SIZE)
    kparams = pack_params(params)

    out = jax.block_until_ready(matchnn_forward(x1, x2, kparams))
    assert out.shape == (BATCH, 1), out.shape

    # Tight check vs a reference that uses the same bf16 matmul operands.
    ref_bf16 = matchnn_ref(x1, x2, params, matmul_dtype=jnp.bfloat16)
    assert jnp.allclose(out, ref_bf16, atol=5e-3), (out, ref_bf16)

    # Loose check vs the full-f32 reference (bf16 MXU operands -> ~1e-3 rel error).
    ref_f32 = matchnn_ref(x1, x2, params, matmul_dtype=jnp.float32)
    assert jnp.allclose(out, ref_f32, atol=3e-2), (out, ref_f32)

    print("KERNEL_OK")
</pallas_src>

<mosaic_0001>
module attributes {stable_mosaic.version = 11 : i64} {
  func.func @matchnn_kernel(%arg0: memref<8x24xf32, #tpu.memory_space<vmem>>, %arg1: memref<8x24xf32, #tpu.memory_space<vmem>>, %arg2: memref<24x128xbf16, #tpu.memory_space<vmem>>, %arg3: memref<128x512xbf16, #tpu.memory_space<vmem>>, %arg4: memref<2x512xf32, #tpu.memory_space<vmem>>, %arg5: memref<8x128xf32, #tpu.memory_space<vmem>>) attributes {dimension_semantics = [], scalar_prefetch = 0 : i64, scratch_operands = 0 : i64, tpu.core_type = #tpu.core_type<tc>} {
    %c0 = arith.constant 0 : index
    %c0_0 = arith.constant 0 : index
    %0 = vector.load %arg0[%c0, %c0_0] : memref<8x24xf32, #tpu.memory_space<vmem>>, vector<8x24xf32>
    %c0_1 = arith.constant 0 : index
    %c0_2 = arith.constant 0 : index
    %1 = vector.load %arg1[%c0_1, %c0_2] : memref<8x24xf32, #tpu.memory_space<vmem>>, vector<8x24xf32>
    %cst = arith.constant dense<0.000000e+00> : vector<24xf32>
    %2 = vector.multi_reduction <add>, %0, %cst [0] : vector<8x24xf32> to vector<24xf32>
    %3 = vector.shape_cast %2 : vector<24xf32> to vector<1x24xf32>
    %cst_3 = arith.constant 8.000000e+00 : f32
    %4 = vector.broadcast %cst_3 : f32 to vector<1x24xf32>
    %5 = arith.divf %3, %4 : vector<1x24xf32>
    %6 = arith.mulf %0, %0 : vector<8x24xf32>
    %cst_4 = arith.constant dense<0.000000e+00> : vector<24xf32>
    %7 = vector.multi_reduction <add>, %6, %cst_4 [0] : vector<8x24xf32> to vector<24xf32>
    %8 = vector.shape_cast %7 : vector<24xf32> to vector<1x24xf32>
    %cst_5 = arith.constant 8.000000e+00 : f32
    %9 = vector.broadcast %cst_5 : f32 to vector<1x24xf32>
    %10 = arith.divf %8, %9 : vector<1x24xf32>
    %11 = arith.mulf %5, %5 : vector<1x24xf32>
    %12 = arith.subf %10, %11 : vector<1x24xf32>
    %cst_6 = arith.constant 0.000000e+00 : f32
    %13 = vector.broadcast %cst_6 : f32 to vector<1x24xf32>
    %14 = arith.maximumf %12, %13 : vector<1x24xf32>
    %cst_7 = arith.constant 9.99999974E-6 : f32
    %15 = vector.broadcast %cst_7 : f32 to vector<1x24xf32>
    %16 = arith.addf %14, %15 : vector<1x24xf32>
    %17 = math.rsqrt %16 : vector<1x24xf32>
    %cst_8 = arith.constant dense<0.000000e+00> : vector<24xf32>
    %18 = vector.multi_reduction <add>, %1, %cst_8 [0] : vector<8x24xf32> to vector<24xf32>
    %19 = vector.shape_cast %18 : vector<24xf32> to vector<1x24xf32>
    %cst_9 = arith.constant 8.000000e+00 : f32
    %20 = vector.broadcast %cst_9 : f32 to vector<1x24xf32>
    %21 = arith.divf %19, %20 : vector<1x24xf32>
    %22 = arith.mulf %1, %1 : vector<8x24xf32>
    %cst_10 = arith.constant dense<0.000000e+00> : vector<24xf32>
    %23 = vector.multi_reduction <add>, %22, %cst_10 [0] : vector<8x24xf32> to vector<24xf32>
    %24 = vector.shape_cast %23 : vector<24xf32> to vector<1x24xf32>
    %cst_11 = arith.constant 8.000000e+00 : f32
    %25 = vector.broadcast %cst_11 : f32 to vector<1x24xf32>
    %26 = arith.divf %24, %25 : vector<1x24xf32>
    %27 = arith.mulf %21, %21 : vector<1x24xf32>
    %28 = arith.subf %26, %27 : vector<1x24xf32>
    %cst_12 = arith.constant 0.000000e+00 : f32
    %29 = vector.broadcast %cst_12 : f32 to vector<1x24xf32>
    %30 = arith.maximumf %28, %29 : vector<1x24xf32>
    %cst_13 = arith.constant 9.99999974E-6 : f32
    %31 = vector.broadcast %cst_13 : f32 to vector<1x24xf32>
    %32 = arith.addf %30, %31 : vector<1x24xf32>
    %33 = math.rsqrt %32 : vector<1x24xf32>
    %34 = vector.broadcast %5 : vector<1x24xf32> to vector<8x24xf32>
    %35 = arith.subf %0, %34 : vector<8x24xf32>
    %36 = vector.broadcast %17 : vector<1x24xf32> to vector<8x24xf32>
    %37 = arith.mulf %35, %36 : vector<8x24xf32>
    %38 = arith.truncf %37 : vector<8x24xf32> to vector<8x24xbf16>
    %39 = vector.broadcast %21 : vector<1x24xf32> to vector<8x24xf32>
    %40 = arith.subf %1, %39 : vector<8x24xf32>
    %41 = vector.broadcast %33 : vector<1x24xf32> to vector<8x24xf32>
    %42 = arith.mulf %40, %41 : vector<8x24xf32>
    %43 = arith.truncf %42 : vector<8x24xf32> to vector<8x24xbf16>
    %44 = tpu.concatenate %38, %43 in 0 : vector<8x24xbf16>, vector<8x24xbf16> -> vector<16x24xbf16>
    %c0_14 = arith.constant 0 : index
    %c0_15 = arith.constant 0 : index
    %45 = vector.load %arg4[%c0_14, %c0_15] : memref<2x512xf32, #tpu.memory_space<vmem>>, vector<2x512xf32>
    %46 = vector.extract_strided_slice %45 {offsets = [0, 0], sizes = [1, 128], strides = [1, 1]} : vector<2x512xf32> to vector<1x128xf32>
    %47 = vector.extract_strided_slice %45 {offsets = [1, 0], sizes = [1, 512], strides = [1, 1]} : vector<2x512xf32> to vector<1x512xf32>
    %c0_16 = arith.constant 0 : index
    %c0_17 = arith.constant 0 : index
    %48 = vector.load %arg2[%c0_16, %c0_17] : memref<24x128xbf16, #tpu.memory_space<vmem>>, vector<24x128xbf16>
    %cst_18 = arith.constant dense<0.000000e+00> : vector<16x128xf32>
    %49 = tpu.matmul %44, %48, %cst_18 {dimension_numbers = #tpu.dot_dimension_numbers<[1], [0], [0], [1], [0, 0, 1, 1], [], []>} : vector<16x24xbf16>, vector<24x128xbf16>, vector<16x128xf32> -> vector<16x128xf32>
    %50 = vector.broadcast %46 : vector<1x128xf32> to vector<16x128xf32>
    %51 = arith.addf %49, %50 : vector<16x128xf32>
    %cst_19 = arith.constant 0.000000e+00 : f32
    %52 = vector.broadcast %cst_19 : f32 to vector<16x128xf32>
    %53 = arith.maximumf %51, %52 : vector<16x128xf32>
    %54 = vector.shape_cast %53 : vector<16x128xf32> to vector<2x8x128xf32>
    %cst_20 = arith.constant dense<0.000000e+00> : vector<2x128xf32>
    %55 = vector.multi_reduction <add>, %54, %cst_20 [1] : vector<2x8x128xf32> to vector<2x128xf32>
    %56 = vector.shape_cast %55 : vector<2x128xf32> to vector<2x1x128xf32>
    %cst_21 = arith.constant 8.000000e+00 : f32
    %57 = vector.broadcast %cst_21 : f32 to vector<2x1x128xf32>
    %58 = arith.divf %56, %57 : vector<2x1x128xf32>
    %59 = arith.mulf %54, %54 : vector<2x8x128xf32>
    %cst_22 = arith.constant dense<0.000000e+00> : vector<2x128xf32>
    %60 = vector.multi_reduction <add>, %59, %cst_22 [1] : vector<2x8x128xf32> to vector<2x128xf32>
    %61 = vector.shape_cast %60 : vector<2x128xf32> to vector<2x1x128xf32>
    %cst_23 = arith.constant 8.000000e+00 : f32
    %62 = vector.broadcast %cst_23 : f32 to vector<2x1x128xf32>
    %63 = arith.divf %61, %62 : vector<2x1x128xf32>
    %64 = arith.mulf %58, %58 : vector<2x1x128xf32>
    %65 = arith.subf %63, %64 : vector<2x1x128xf32>
    %cst_24 = arith.constant 0.000000e+00 : f32
    %66 = vector.broadcast %cst_24 : f32 to vector<2x1x128xf32>
    %67 = arith.maximumf %65, %66 : vector<2x1x128xf32>
    %68 = vector.broadcast %58 : vector<2x1x128xf32> to vector<2x8x128xf32>
    %69 = arith.subf %54, %68 : vector<2x8x128xf32>
    %cst_25 = arith.constant 9.99999974E-6 : f32
    %70 = vector.broadcast %cst_25 : f32 to vector<2x1x128xf32>
    %71 = arith.addf %67, %70 : vector<2x1x128xf32>
    %72 = math.rsqrt %71 : vector<2x1x128xf32>
    %73 = vector.broadcast %72 : vector<2x1x128xf32> to vector<2x8x128xf32>
    %74 = arith.mulf %69, %73 : vector<2x8x128xf32>
    %75 = arith.truncf %74 : vector<2x8x128xf32> to vector<2x8x128xbf16>
    %76 = vector.shape_cast %75 : vector<2x8x128xbf16> to vector<16x128xbf16>
    %c0_26 = arith.constant 0 : index
    %c0_27 = arith.constant 0 : index
    %77 = vector.load %arg3[%c0_26, %c0_27] : memref<128x512xbf16, #tpu.memory_space<vmem>>, vector<128x512xbf16>
    %cst_28 = arith.constant dense<0.000000e+00> : vector<16x512xf32>
    %78 = tpu.matmul %76, %77, %cst_28 {dimension_numbers = #tpu.dot_dimension_numbers<[1], [0], [0], [1], [0, 0, 1, 1], [], []>} : vector<16x128xbf16>, vector<128x512xbf16>, vector<16x512xf32> -> vector<16x512xf32>
    %79 = vector.broadcast %47 : vector<1x512xf32> to vector<16x512xf32>
    %80 = arith.addf %78, %79 : vector<16x512xf32>
    %81 = vector.shape_cast %80 : vector<16x512xf32> to vector<2x8x512xf32>
    %82 = vector.extract_strided_slice %81 {offsets = [0, 0, 0], sizes = [1, 8, 512], strides = [1, 1, 1]} : vector<2x8x512xf32> to vector<1x8x512xf32>
    %83 = vector.shape_cast %82 : vector<1x8x512xf32> to vector<8x512xf32>
    %84 = vector.extract_strided_slice %81 {offsets = [1, 0, 0], sizes = [1, 8, 512], strides = [1, 1, 1]} : vector<2x8x512xf32> to vector<1x8x512xf32>
    %85 = vector.shape_cast %84 : vector<1x8x512xf32> to vector<8x512xf32>
    %86 = arith.mulf %83, %85 : vector<8x512xf32>
    %cst_29 = arith.constant dense<0.000000e+00> : vector<8xf32>
    %87 = vector.multi_reduction <add>, %86, %cst_29 [1] : vector<8x512xf32> to vector<8xf32>
    %88 = vector.shape_cast %87 : vector<8xf32> to vector<8x1xf32>
    %89 = arith.mulf %83, %83 : vector<8x512xf32>
    %cst_30 = arith.constant dense<0.000000e+00> : vector<8xf32>
    %90 = vector.multi_reduction <add>, %89, %cst_30 [1] : vector<8x512xf32> to vector<8xf32>
    %91 = vector.shape_cast %90 : vector<8xf32> to vector<8x1xf32>
    %92 = arith.mulf %85, %85 : vector<8x512xf32>
    %cst_31 = arith.constant dense<0.000000e+00> : vector<8xf32>
    %93 = vector.multi_reduction <add>, %92, %cst_31 [1] : vector<8x512xf32> to vector<8xf32>
    %94 = vector.shape_cast %93 : vector<8xf32> to vector<8x1xf32>
    %95 = arith.mulf %91, %94 : vector<8x1xf32>
    %cst_32 = arith.constant 1.000000e-16 : f32
    %96 = vector.broadcast %cst_32 : f32 to vector<8x1xf32>
    %97 = arith.maximumf %95, %96 : vector<8x1xf32>
    %98 = math.rsqrt %97 : vector<8x1xf32>
    %99 = arith.mulf %88, %98 : vector<8x1xf32>
    %cst_33 = arith.constant 0.000000e+00 : f32
    %cst_34 = arith.constant 1.000000e+00 : f32
    %100 = vector.broadcast %cst_33 : f32 to vector<8x1xf32>
    %101 = arith.maximumf %100, %99 : vector<8x1xf32>
    %102 = vector.broadcast %cst_34 : f32 to vector<8x1xf32>
    %103 = arith.minimumf %102, %101 : vector<8x1xf32>
    %104 = vector.shape_cast %103 : vector<8x1xf32> to vector<8x1xf32>
    %105 = vector.broadcast %104 : vector<8x1xf32> to vector<8x128xf32>
    %c0_35 = arith.constant 0 : index
    %c0_36 = arith.constant 0 : index
    %106 = vector.load %arg5[%c0_35, %c0_36] : memref<8x128xf32, #tpu.memory_space<vmem>>, vector<8x128xf32>
    tpu.vector_store %arg5[%c0_35, %c0_36], %105 {strides = array<i32>} : memref<8x128xf32, #tpu.memory_space<vmem>>, vector<8x128xf32>,
    return
  }
}

</mosaic_0001>

<bundles_post_ra>
// kernel: tpu_custom_call.1
= control target key start
LH: loop header
LB: loop body
LE: loop exit
PB: predicated region body
PF: predicated region fallthrough
CT: control target
= control target key end

     0   :  { %10 = vsyncpa [#allocation3], 0  ;;  %s980_s0 = inlined_call_operand.hbm [shape: f32[8,24], index: 0, kind: input, shape index: {}]   ;;  %s981_s1 = inlined_call_operand.hbm [shape: f32[8,24], index: 1, kind: input, shape index: {}]   ;;  %s982_s2 = inlined_call_operand.hbm [shape: bf16[24,128], index: 2, kind: input, shape index: {}]   ;;  %s983_s3 = inlined_call_operand.hbm [shape: bf16[128,512], index: 3, kind: input, shape index: {}]   ;;  %s984_s4 = inlined_call_operand.vmem [shape: f32[2,512], index: 4, kind: input, shape index: {}]   ;;  %s985_s5 = inlined_call_operand.hbm [shape: f32[8,128], index: 5, kind: output, shape index: {}]  }
   0x1   :  { %11 = vsyncpa [#allocation6], 0 }
   0x2   :  { %12 = vsyncpa [#allocation9], 0 }
   0x3   :  { %13 = vsyncpa [#allocation4], 0  ;;  %s854_s18 = smov [#allocation5]   ;;  %s855_s20 = smov [#allocation2]  }
   0x4   :  { %s30_s19 = sshll.u32 %s854_s18, 4  ;;  %s20_s21 = sshll.u32 %s855_s20, 4  ;;  %s31_s19 = int_to_ptr.vmem [resolvable:$true] %s30_s19  ;;  %s21_s21 = int_to_ptr.vmem [resolvable:$true] %s20_s21 }
   0x5   :  { %s736_s24 = scalar_lea.hbm %s981_s1, 128 }
   0x6   :  { %p737_p0 = scmp.ne.s32.totalorder %s981_s1, %s736_s24  ;;  %p740_p1 = scmp.lt.u32.totalorder %s736_s24, %s981_s1 }
   0x8   :  { %p742_p2 = pnand %p740_p1, %p737_p0 }
   0xa   :  { %745 = shalt.err (!%p742_p2)
}
   0xb   :  { %s746_s29 = scalar_lea.vmem %s31_s19, 128  ;;  %p751_p4 = scmp.lt.s32.totalorder %s31_s19, %s31_s19 }
   0xc   :  { %p747_p3 = scmp.ne.s32.totalorder %s31_s19, %s746_s29  ;;  %p752_p5 = scmp.lt.s32.totalorder %s746_s29, %s746_s29 }
   0xe   :  { %p753_p6 = por %p752_p5, %p751_p4 }
  0x10   :  { %p754_p7 = pnand %p753_p6, %p747_p3 }
  0x12   :  { %757 = shalt.err (!%p754_p7)
}
  0x13   :  { %33 = dma.hbm_to_vmem [thread:$0]  %s981_s1, 128, %s31_s19, [#allocation6]  }
  0x14   :  { %s758_s9 = scalar_lea.hbm %s980_s0, 128 }
  0x15   :  { %p759_p8 = scmp.ne.s32.totalorder %s980_s0, %s758_s9  ;;  %p762_p9 = scmp.lt.u32.totalorder %s758_s9, %s980_s0 }
  0x17   :  { %p764_p10 = pnand %p762_p9, %p759_p8 }
  0x19   :  { %767 = shalt.err (!%p764_p10)
}
  0x1a   :  { %s768_s14 = scalar_lea.vmem %s21_s21, 128  ;;  %p773_p12 = scmp.lt.s32.totalorder %s21_s21, %s21_s21 }
  0x1b   :  { %p769_p11 = scmp.ne.s32.totalorder %s21_s21, %s768_s14  ;;  %p774_p13 = scmp.lt.s32.totalorder %s768_s14, %s768_s14 }
  0x1d   :  { %p775_p0 = por %p774_p13, %p773_p12 }
  0x1f   :  { %p776_p1 = pnand %p775_p0, %p769_p11 }
  0x21   :  { %779 = shalt.err (!%p776_p1)
}
  0x22   :  { %23 = dma.hbm_to_vmem [thread:$0]  %s980_s0, 128, %s21_s21, [#allocation3]  }
  0x23   :  { %s856_s16 = smov [#allocation7]   ;;  %s780_s20 = scalar_lea.hbm %s982_s2, 192 }
  0x24   :  { %s39_s17 = sshll.u32 %s856_s16, 4  ;;  %p781_p2 = scmp.ne.s32.totalorder %s982_s2, %s780_s20  ;;  %s40_s17 = int_to_ptr.vmem [resolvable:$true] %s39_s17 }
  0x25   :  { %p784_p3 = scmp.lt.u32.totalorder %s780_s20, %s982_s2 }
  0x27   :  { %p786_p4 = pnand %p784_p3, %p781_p2 }
  0x29   :  { %789 = shalt.err (!%p786_p4)
}
  0x2a   :  { %s790_s26 = scalar_lea.vmem %s40_s17, 192  ;;  %p795_p6 = scmp.lt.s32.totalorder %s40_s17, %s40_s17 }
  0x2b   :  { %p791_p5 = scmp.ne.s32.totalorder %s40_s17, %s790_s26  ;;  %p796_p7 = scmp.lt.s32.totalorder %s790_s26, %s790_s26 }
  0x2d   :  { %p797_p8 = por %p796_p7, %p795_p6 }
  0x2f   :  { %p798_p9 = pnand %p797_p8, %p791_p5 }
  0x31   :  { %801 = shalt.err (!%p798_p9)
}
  0x32   :  { %s857_s0 = smov 64   ;;  %s858_s21 = smov 4  }
  0x33   :  { %45 = dma.hbm_to_vmem [thread:$0]  %s982_s2, 192, %s40_s17, [#allocation6], %s857_s0, %s857_s0, %s858_s21  }
  0x34   :  { %s859_s29 = smov [#allocation8]   ;;  %s802_s8 = scalar_lea.hbm %s983_s3, 4096 }
  0x35   :  { %s51_s30 = sshll.u32 %s859_s29, 4  ;;  %p803_p10 = scmp.ne.s32.totalorder %s983_s3, %s802_s8  ;;  %s52_s30 = int_to_ptr.vmem [resolvable:$true] %s51_s30 }
  0x36   :  { %p806_p11 = scmp.lt.u32.totalorder %s802_s8, %s983_s3 }
  0x38   :  { %p808_p12 = pnand %p806_p11, %p803_p10 }
  0x3a   :  { %811 = shalt.err (!%p808_p12)
}
  0x3b   :  { %s812_s13 = scalar_lea.vmem %s52_s30, 4096  ;;  %p817_p0 = scmp.lt.s32.totalorder %s52_s30, %s52_s30 }
  0x3c   :  { %p813_p13 = scmp.ne.s32.totalorder %s52_s30, %s812_s13  ;;  %p818_p1 = scmp.lt.s32.totalorder %s812_s13, %s812_s13 }
  0x3e   :  { %p819_p2 = por %p818_p1, %p817_p0 }
  0x40   :  { %p820_p3 = pnand %p819_p2, %p813_p13 }
  0x42   :  { %823 = shalt.err (!%p820_p3)
}
  0x43   :  { %s860_s2 = smov 256   ;;  %s861_s14 = smov 16  }
  0x44   :  { %57 = dma.hbm_to_vmem [thread:$0]  %s983_s3, 4096, %s52_s30, [#allocation9], %s860_s2, %s860_s2, %s861_s14  }
  0x45   :  { %846 = dma.done.wait [#allocation3], 128  }
  0x46   :  { %847 = vsyncadd [#allocation3], 4294967168 }
  0x47   :  { %848 = dma.done.wait [#allocation6], 320  }
  0x48   :  { %849 = vsyncadd [#allocation6], 4294966976 }
  0x49   :  { %850 = dma.done.wait [#allocation9], 4096  }
  0x4a   :  { %851 = vsyncadd [#allocation9], 4294963200  ;;  %v862_v0 = vmov 0.0   ;;  %vm863_vm0 = vmmov 0   ;;  %vm129_vm1 = vcmask 1043456   ;;  %v676_v1 = vld [vmem:[#allocation7] sm:$0xff]  }
  0x4b   :  { %656 = vmatprep.subr.bf16.mxu0 %v862_v0  ;;  %660 = vmatprep.mubr.msk.bf16.mxu0 %vm863_vm0, %v862_v0  ;;  %vm75_vm2 = vcmask 195584   ;;  %v677_v2 = vld [vmem:[#allocation7 + $0x8] ss:$0 sps:$4 sm:$0xff]   ;;  %v73_v3 = vld [vmem:[#allocation2] sm:$0xff]  ;;  %v74_v4 = vld [vmem:[#allocation5] sm:$0xff] }
  0x4c   :  { %657 = vmatpush3.bf16.msra.mxu0 %v676_v1  ;;  %v76_v5 = vsel %vm75_vm2, %v73_v3, 0.0  ;;  %v85_v6 = vmul.f32 %v73_v3, %v73_v3  ;;  %v153_v7 = vsel %vm129_vm1, %v677_v2, 0  ;;  %v99_v9 = vsel %vm75_vm2, %v74_v4, 0.0  ;;  %v678_v58 = vld [vmem:[#allocation8 + $0x4] ss:$16 sps:$4 sm:$0xff]  }
  0x4d   :  { %658 = vmatprep.subr.bf16.mxu0 %v862_v0  ;;  %v77_v8 = vrot.slane %v76_v5, 4  ;;  %v107_v10 = vmul.f32 %v74_v4, %v74_v4  ;;  %v100_v12 = vrot.slane %v99_v9, 4  ;;  %v682_v59 = vld [vmem:[#allocation8 + $0xc] ss:$16 sps:$4 sm:$0xff]   ;;  %v680_v60 = vld [vmem:[#allocation8 + $0x8] ss:$16 sps:$4 sm:$0xff]   ;;  %479 = vmatprep.subr.bf16.mxu1 %v678_v58 }
  0x4e   :  { %v86_v11 = vsel %vm75_vm2, %v85_v6, 0.0  ;;  %v683_v61 = vld [vmem:[#allocation8] ss:$16 sps:$4 sm:$0xff]   ;;  %v684_v62 = vld [vmem:[#allocation8 + $0x24] ss:$16 sps:$4 sm:$0xff]  }
  0x4f   :  { %v78_v13 = vadd.f32 %v77_v8, %v76_v5  ;;  %v87_v14 = vrot.slane %v86_v11, 4  ;;  %v108_v15 = vsel %vm75_vm2, %v107_v10, 0.0  ;;  %v101_v16 = vadd.f32 %v100_v12, %v99_v9  ;;  %480 = vmatpush1.bf16.msra.mxu1 %v683_v61  ;;  %v688_v63 = vld [vmem:[#allocation8 + $0x2c] ss:$16 sps:$4 sm:$0xff]   ;;  %v686_v0 = vld [vmem:[#allocation8 + $0x28] ss:$16 sps:$4 sm:$0xff]  }
  0x50   :  { %659 = vmatpush3.bf16.msra.mxu0 %v153_v7  ;;  %v109_v17 = vrot.slane %v108_v15, 4  ;;  %v689_v1 = vld [vmem:[#allocation8 + $0x20] ss:$16 sps:$4 sm:$0xff]   ;;  %481 = vmatprep.subr.bf16.mxu1 %v684_v62  ;;  %v690_v2 = vld [vmem:[#allocation8 + $0x44] ss:$16 sps:$4 sm:$0xff]  }
  0x51   :  { %v79_v18 = vrot.slane %v78_v13, 2  ;;  %v88_v19 = vadd.f32 %v87_v14, %v86_v11  ;;  %v102_v20 = vrot.slane %v101_v16, 2  ;;  %522 = vmatprep.subr.bf16.mxu0 %v682_v59  ;;  %v695_v5 = vld [vmem:[#allocation8 + $0x40] ss:$16 sps:$4 sm:$0xff]   ;;  %v696_v6 = vld [vmem:[#allocation8 + $0x64] ss:$16 sps:$4 sm:$0xff]  }
  0x52   :  { %v110_v21 = vadd.f32 %v109_v17, %v108_v15  ;;  %v698_v7 = vld [vmem:[#allocation8 + $0x68] ss:$16 sps:$4 sm:$0xff]   ;;  %v700_v8 = vld [vmem:[#allocation8 + $0x6c] ss:$16 sps:$4 sm:$0xff]   ;;  %v701_v9 = vld [vmem:[#allocation8 + $0x60] ss:$16 sps:$4 sm:$0xff]  }
  0x53   :  { %v80_v22 = vadd.f32 %v79_v18, %v78_v13  ;;  %v89_v23 = vrot.slane %v88_v19, 2  ;;  %v103_v24 = vadd.f32 %v102_v20, %v101_v16  ;;  %482 = vmatpush1.bf16.msra.mxu1 %v689_v1  ;;  %v702_v10 = vld [vmem:[#allocation8 + $0x84] ss:$16 sps:$4 sm:$0xff]   ;;  %v706_v11 = vld [vmem:[#allocation8 + $0x8c] ss:$16 sps:$4 sm:$0xff]   ;;  %v864_v16 = vmov 0  }
  0x54   :  { %v111_v25 = vrot.slane %v110_v21, 2  ;;  %483 = vmatprep.subr.bf16.mxu1 %v690_v2  ;;  %v704_v12 = vld [vmem:[#allocation8 + $0x88] ss:$16 sps:$4 sm:$0xff]   ;;  %v707_v13 = vld [vmem:[#allocation8 + $0x80] ss:$16 sps:$4 sm:$0xff]   ;;  %511 = vmatprep.mubr.bf16.mxu1 %v864_v16 }
  0x55   :  { %v81_v26 = vrot.slane %v80_v22, 1  ;;  %v90_v27 = vadd.f32 %v89_v23, %v88_v19  ;;  %v104_v28 = vrot.slane %v103_v24, 1  ;;  %v708_v14 = vld [vmem:[#allocation8 + $0xa4] ss:$16 sps:$4 sm:$0xff]   ;;  %v712_v15 = vld [vmem:[#allocation8 + $0xac] ss:$16 sps:$4 sm:$0xff]  }
  0x56   :  { %v112_v29 = vadd.f32 %v111_v25, %v110_v21  ;;  %v710_v17 = vld [vmem:[#allocation8 + $0xa8] ss:$16 sps:$4 sm:$0xff]   ;;  %v713_v18 = vld [vmem:[#allocation8 + $0xa0] ss:$16 sps:$4 sm:$0xff]   ;;  %v714_v19 = vld [vmem:[#allocation8 + $0xc4] ss:$16 sps:$4 sm:$0xff]  }
  0x57   :  { %v82_v30 = vadd.f32 %v81_v26, %v80_v22  ;;  %v91_v31 = vrot.slane %v90_v27, 1  ;;  %v105_v32 = vadd.f32 %v104_v28, %v103_v24  ;;  %484 = vmatpush1.bf16.msra.mxu1 %v695_v5  ;;  %v718_v20 = vld [vmem:[#allocation8 + $0xcc] ss:$16 sps:$4 sm:$0xff]   ;;  %v716_v21 = vld [vmem:[#allocation8 + $0xc8] ss:$16 sps:$4 sm:$0xff]  }
  0x58   :  { %v113_v33 = vrot.slane %v112_v29, 1  ;;  %485 = vmatprep.subr.bf16.mxu1 %v696_v6  ;;  %v719_v22 = vld [vmem:[#allocation8 + $0xc0] ss:$16 sps:$4 sm:$0xff]   ;;  %v720_v23 = vld [vmem:[#allocation8 + $0xe4] ss:$16 sps:$4 sm:$0xff]  }
  0x59   :  { %v84_v34 = vmul.f32 0.125, %v82_v30  ;;  %v92_v35 = vadd.f32 %v91_v31, %v90_v27  ;;  %v106_v36 = vmul.f32 0.125, %v105_v32  ;;  %v724_v24 = vld [vmem:[#allocation8 + $0xec] ss:$16 sps:$4 sm:$0xff]   ;;  %v722_v25 = vld [vmem:[#allocation8 + $0xe8] ss:$16 sps:$4 sm:$0xff]   ;;  %v137_v27 = vlaneseq }
  0x5a   :  { %v114_v37 = vadd.f32 %v113_v33, %v112_v29  ;;  %v725_v26 = vld [vmem:[#allocation8 + $0xe0] ss:$16 sps:$4 sm:$0xff]   ;;  %v957_v30 = vld [vmem:[%s984_s4] sm:$0xff]  ;;  %s865_s4 = smov [#allocation10]  }
  0x5b   :  { %v93_v38 = vmul.f32 0.125, %v92_v35  ;;  %v94_v39 = vmul.f32 %v84_v34, %v84_v34  ;;  %v116_v41 = vmul.f32 %v106_v36, %v106_v36  ;;  %v121_v48 = vsub.f32 %v73_v3, %v84_v34  ;;  %v694_v3 = vld [vmem:[#allocation8 + $0x4c] ss:$16 sps:$4 sm:$0xff]   ;;  %486 = vmatpush1.bf16.msra.mxu1 %v701_v9  ;;  %s605_s17 = sshll.u32 %s865_s4, 4  ;;  %s606_s17 = int_to_ptr.vmem [resolvable:$true] %s605_s17 }
  0x5c   :  { %v115_v40 = vmul.f32 0.125, %v114_v37  ;;  %v124_v49 = vsub.f32 %v74_v4, %v106_v36  ;;  %v692_v4 = vld [vmem:[#allocation8 + $0x48] ss:$16 sps:$4 sm:$0xff]   ;;  %487 = vmatprep.subr.bf16.mxu1 %v702_v10  ;;  %v951_v28 = vshrl.u32 %v137_v27, 7  ;;  %s824_s18 = scalar_lea.vmem %s606_s17, 128  ;;  %p829_p5 = scmp.lt.s32.totalorder %s606_s17, %s606_s17 }
  0x5d   :  { %v95_v42 = vsub.f32 %v93_v38, %v94_v39  ;;  %p825_p4 = scmp.ne.s32.totalorder %s606_s17, %s824_s18  ;;  %p830_p6 = scmp.lt.s32.totalorder %s824_s18, %s824_s18 }
  0x5e   :  { %v117_v43 = vsub.f32 %v115_v40, %v116_v41  ;;  %v139_v29 = vsub.s32 0, %v951_v28 }
  0x5f   :  { %v96_v44 = vmax.f32 %v95_v42, 0.0  ;;  %488 = vmatpush1.bf16.msra.mxu1 %v707_v13  ;;  %p831_p7 = por %p830_p6, %p829_p5 }
  0x60   :  { %v118_v45 = vmax.f32 %v117_v43, 0.0  ;;  %489 = vmatprep.subr.bf16.mxu1 %v708_v14  ;;  %v140_v31 = vrot.slane %v957_v30, %v139_v29 }
  0x61   :  { %v97_v46 = vadd.f32 1e-05, %v96_v44  ;;  %p832_p8 = pnand %p831_p7, %p825_p4 }
  0x62   :  { %v119_v47 = vadd.f32 1e-05, %v118_v45 }
  0x63   :  { %726 = vrsqrt.f32 %v97_v46  ;;  %490 = vmatpush1.bf16.msra.mxu1 %v713_v18 }
  0x64   :  { %728 = vrsqrt.f32 %v119_v47  ;;  %491 = vmatprep.subr.bf16.mxu1 %v714_v19 }
  0x67   :  { %492 = vmatpush1.bf16.msra.mxu1 %v719_v22  ;;  %v287_v22 = vsub.s32 5, %v951_v28 }
  0x68   :  { %493 = vmatprep.subr.bf16.mxu1 %v720_v23  ;;  %v283_v23 = vsub.s32 3, %v951_v28 }
  0x6a   :  { %v284_v27 = vrot.slane %v957_v30, %v283_v23 }
  0x6b   :  { %494 = vmatpush1.bf16.msra.mxu1 %v725_v26  ;;  %v288_v26 = vrot.slane %v957_v30, %v287_v22 }
  0x6d   :  { %v727_v50 = vpop.eup %726 }
  0x6e   :  { %v729_v51 = vpop.eup %728  ;;  %v122_v52 = vmul.f32 %v727_v50, %v121_v48 }
  0x6f   :  { %v125_v53 = vmul.f32 %v729_v51, %v124_v49 }
  0x70   :  { %v123_v54 = vpack.c.bf16 %v122_v52, %v122_v52 }
  0x71   :  { %v126_v55 = vpack.c.bf16 %v125_v53, %v125_v53 }
  0x73   :  { %v128_v56 = vrot.slane %v126_v55, 4 }
  0x75   :  { %v132_v57 = vsel %vm129_vm1, %v123_v54, %v128_v56 }
  0x76   :  { %661 = vmatmul.mubr.msk.bf16.vlgmr.msra.gmra.mrb[0].mxu0 %vm75_vm2, %v132_v57 }
  0x77   :  { %523 = vmatpush1.bf16.msra.mxu0 %v680_v60  ;;  %554 = vmatprep.mubr.bf16.mxu0 %v864_v16 }
  0x78   :  { %524 = vmatprep.subr.bf16.mxu0 %v688_v63 }
  0x7b   :  { %525 = vmatpush1.bf16.msra.mxu0 %v686_v0 }
  0x7c   :  { %526 = vmatprep.subr.bf16.mxu0 %v694_v3 }
  0x7f   :  { %527 = vmatpush1.bf16.msra.mxu0 %v692_v4 }
  0x80   :  { %528 = vmatprep.subr.bf16.mxu0 %v700_v8 }
  0x83   :  { %529 = vmatpush1.bf16.msra.mxu0 %v698_v7 }
  0x84   :  { %530 = vmatprep.subr.bf16.mxu0 %v706_v11 }
  0x87   :  { %531 = vmatpush1.bf16.msra.mxu0 %v704_v12 }
  0x88   :  { %532 = vmatprep.subr.bf16.mxu0 %v712_v15 }
  0x8b   :  { %533 = vmatpush1.bf16.msra.mxu0 %v710_v17 }
  0x8c   :  { %534 = vmatprep.subr.bf16.mxu0 %v718_v20 }
  0x8f   :  { %535 = vmatpush1.bf16.msra.mxu0 %v716_v21  ;;  %v279_v21 = vsub.s32 1, %v951_v28 }
  0x90   :  { %536 = vmatprep.subr.bf16.mxu0 %v724_v24  ;;  %v291_v24 = vsub.s32 7, %v951_v28 }
  0x92   :  { %v292_v29 = vrot.slane %v957_v30, %v291_v24 }
  0x93   :  { %537 = vmatpush1.bf16.msra.mxu0 %v722_v25  ;;  %v280_v25 = vrot.slane %v957_v30, %v279_v21 }
 0x149   :  { %v189_v32 = vpop.f32.mrb[0].mxu0 }
 0x14a   :  { %v190_v33 = vadd.f32 %v189_v32, %v140_v31  ;;  %v662_v34 = vpop.f32.mrb[1].mxu0  ;;  %v308_v32 = vrot.slane %v288_v26, %v279_v21 }
 0x14b   :  { %v192_v35 = vpop.f32.mrb[2].mxu0  ;;  %v312_v34 = vrot.slane %v292_v29, %v279_v21 }
 0x14c   :  { %v196_v36 = vmax.f32 %v190_v33, 0.0  ;;  %v193_v37 = vadd.f32 %v192_v35, %v140_v31  ;;  %v663_v38 = vpop.f32.mrb[3].mxu0  ;;  %v300_v31 = vrot.slane %v280_v25, %v279_v21  ;;  %v304_v33 = vrot.slane %v284_v27, %v279_v21 }
 0x14e   :  { %v198_v39 = vrot.slane %v196_v36, 4  ;;  %v212_v40 = vmul.f32 %v196_v36, %v196_v36  ;;  %v197_v41 = vmax.f32 %v193_v37, 0.0 }
 0x150   :  { %v199_v42 = vadd.f32 %v198_v39, %v196_v36  ;;  %v214_v43 = vrot.slane %v212_v40, 4  ;;  %v204_v44 = vrot.slane %v197_v41, 4  ;;  %v213_v45 = vmul.f32 %v197_v41, %v197_v41 }
 0x152   :  { %v200_v46 = vrot.slane %v199_v42, 2  ;;  %v215_v47 = vadd.f32 %v214_v43, %v212_v40  ;;  %v205_v48 = vadd.f32 %v204_v44, %v197_v41  ;;  %v220_v49 = vrot.slane %v213_v45, 4 }
 0x154   :  { %v201_v50 = vadd.f32 %v200_v46, %v199_v42  ;;  %v216_v51 = vrot.slane %v215_v47, 2  ;;  %v206_v52 = vrot.slane %v205_v48, 2  ;;  %v221_v53 = vadd.f32 %v220_v49, %v213_v45 }
 0x156   :  { %v217_v54 = vadd.f32 %v216_v51, %v215_v47  ;;  %v207_v55 = vadd.f32 %v206_v52, %v205_v48  ;;  %v222_v56 = vrot.slane %v221_v53, 2  ;;  %v202_v57 = vrot.slane %v201_v50, 1 }
 0x158   :  { %v218_v58 = vrot.slane %v217_v54, 1  ;;  %v223_v59 = vadd.f32 %v222_v56, %v221_v53  ;;  %v203_v60 = vadd.f32 %v202_v57, %v201_v50  ;;  %v208_v61 = vrot.slane %v207_v55, 1 }
 0x15a   :  { %v219_v62 = vadd.f32 %v218_v58, %v217_v54  ;;  %v224_v63 = vrot.slane %v223_v59, 1  ;;  %v209_v0 = vadd.f32 %v208_v61, %v207_v55  ;;  %v210_v1 = vmul.f32 0.125, %v203_v60 }
 0x15c   :  { %v226_v2 = vmul.f32 0.125, %v219_v62  ;;  %v225_v3 = vadd.f32 %v224_v63, %v223_v59  ;;  %v211_v4 = vmul.f32 0.125, %v209_v0  ;;  %v228_v5 = vmul.f32 %v210_v1, %v210_v1 }
 0x15d   :  { %v234_v15 = vsub.f32 %v196_v36, %v210_v1 }
 0x15e   :  { %v227_v6 = vmul.f32 0.125, %v225_v3  ;;  %v229_v7 = vmul.f32 %v211_v4, %v211_v4  ;;  %v230_v8 = vsub.f32 %v226_v2, %v228_v5  ;;  %v235_v16 = vsub.f32 %v197_v41, %v211_v4 }
 0x160   :  { %v231_v9 = vsub.f32 %v227_v6, %v229_v7  ;;  %v232_v10 = vmax.f32 %v230_v8, 0.0 }
 0x162   :  { %v233_v11 = vmax.f32 %v231_v9, 0.0  ;;  %v236_v12 = vadd.f32 1e-05, %v232_v10 }
 0x164   :  { %v237_v13 = vadd.f32 1e-05, %v233_v11  ;;  %730 = vrsqrt.f32 %v236_v12 }
 0x166   :  { %732 = vrsqrt.f32 %v237_v13 }
 0x16e   :  { %v731_v14 = vpop.eup %730 }
 0x16f   :  { %v240_v18 = vmul.f32 %v731_v14, %v234_v15 }
 0x170   :  { %v733_v17 = vpop.eup %732 }
 0x171   :  { %v241_v19 = vmul.f32 %v733_v17, %v235_v16 }
 0x173   :  { %v652_v20 = vpack.c.bf16 %v241_v19, %v240_v18 }
 0x175   :  { %512 = vmatmul.mubr.bf16.vlgmr.msra.gmra.mrb[0].mxu1 %v652_v20  ;;  %555 = vmatmul.mubr.bf16.vlgmr.msra.gmra.mrb[4].mxu0 %v652_v20 }
 0x248   :  { %v513_v35 = vpop.f32.mrb[0].mxu1  ;;  %v556_v36 = vpop.f32.mrb[4].mxu0 }
 0x249   :  { %v514_v37 = vadd.f32 %v513_v35, %v300_v31  ;;  %v515_v38 = vpop.f32.mrb[1].mxu1  ;;  %v558_v39 = vpop.f32.mrb[5].mxu0  ;;  %v557_v40 = vadd.f32 %v556_v36, %v308_v32 }
 0x24a   :  { %v516_v41 = vadd.f32 %v515_v38, %v304_v33  ;;  %v517_v28 = vpop.f32.mrb[2].mxu1  ;;  %v560_v42 = vpop.f32.mrb[6].mxu0  ;;  %v559_v44 = vadd.f32 %v558_v39, %v312_v34 }
 0x24b   :  { %v574_v43 = vmul.f32 %v514_v37, %v514_v37  ;;  %v518_v45 = vadd.f32 %v517_v28, %v300_v31  ;;  %v561_v46 = vadd.f32 %v560_v42, %v308_v32  ;;  %v519_v47 = vpop.f32.mrb[3].mxu1  ;;  %v562_v48 = vpop.f32.mrb[7].mxu0  ;;  %v576_v54 = vmul.f32 %v557_v40, %v557_v40 }
 0x24c   :  { %v575_v30 = vmul.f32 %v516_v41, %v516_v41  ;;  %v520_v49 = vadd.f32 %v519_v47, %v304_v33  ;;  %v563_v50 = vadd.f32 %v562_v48, %v312_v34  ;;  %v577_v58 = vmul.f32 %v559_v44, %v559_v44 }
 0x24d   :  { %v565_v51 = vmul.f32 %v518_v45, %v514_v37  ;;  %v583_v52 = vmul.f32 %v518_v45, %v518_v45  ;;  %v567_v53 = vmul.f32 %v561_v46, %v557_v40  ;;  %v585_v60 = vmul.f32 %v561_v46, %v561_v46 }
 0x24e   :  { %v566_v55 = vmul.f32 %v520_v49, %v516_v41  ;;  %v584_v56 = vmul.f32 %v520_v49, %v520_v49  ;;  %v578_v57 = vadd.f32 %v575_v30, %v574_v43  ;;  %v568_v59 = vmul.f32 %v563_v50, %v559_v44 }
 0x24f   :  { %v586_v0 = vmul.f32 %v563_v50, %v563_v50 }
 0x250   :  { %v587_v61 = vadd.f32 %v584_v56, %v583_v52  ;;  %v579_v62 = vadd.f32 %v578_v57, %v576_v54  ;;  %v569_v63 = vadd.f32 %v566_v55, %v565_v51 }
 0x252   :  { %v580_v1 = vadd.f32 %v579_v62, %v577_v58  ;;  %v570_v2 = vadd.f32 %v569_v63, %v567_v53  ;;  %v588_v3 = vadd.f32 %v587_v61, %v585_v60 }
 0x254   :  { %581 = vadd.xlane.f32.xlu0 %v580_v1  ;;  %v571_v4 = vadd.f32 %v570_v2, %v568_v59  ;;  %v589_v5 = vadd.f32 %v588_v3, %v586_v0 }
 0x256   :  { %572 = vadd.xlane.f32.xlu1 %v571_v4 }
 0x258   :  { %590 = vadd.xlane.f32.xlu0 %v589_v5 }
 0x2e1   :  { %v582_v6 = vpop.xlane.xlu0 %581 }
 0x2e3   :  { %v573_v11 = vpop.xlane.xlu1 %572 }
 0x2e5   :  { %v591_v7 = vpop.xlane.xlu0 %590 }
 0x2e6   :  { %v592_v8 = vmul.f32 %v591_v7, %v582_v6 }
 0x2e8   :  { %v593_v9 = vmax.f32 %v592_v8, 1e-16 }
 0x2ea   :  { %734 = vrsqrt.f32 %v593_v9 }
 0x2f4   :  { %v735_v10 = vpop.eup %734 }
 0x2f5   :  { %v595_v12 = vmul.f32 %v735_v10, %v573_v11 }
 0x2f7   :  { %v596_v13 = vmax.f32 %v595_v12, 0.0 }
 0x2f9   :  { %v597_v14 = vmin.f32 %v596_v13, 1.0 }
 0x2fb   :  { %598 = vst [vmem:[#allocation10] sm:$0xff] %v597_v14 }
 0x2fc   :  { %835 = shalt.err (!%p832_p8)
}
 0x2fd   :  { %s836_s22 = scalar_lea.hbm %s985_s5, 128 }
 0x2fe   :  { %p837_p9 = scmp.ne.s32.totalorder %s985_s5, %s836_s22  ;;  %p840_p10 = scmp.lt.u32.totalorder %s836_s22, %s985_s5 }
 0x300   :  { %p842_p11 = pnand %p840_p10, %p837_p9 }
 0x302   :  { %845 = shalt.err (!%p842_p11)
}
 0x303   :  { %608 = dma.vmem_to_hbm [thread:$0]  %s606_s17, 128, %s985_s5, [#allocation4]  }
 0x304   :  { %852 = dma.done.wait [#allocation4], 128  }
 0x305   :  { %853 = vsyncadd [#allocation4], 4294967168 }
 0x306   :  { %612 = vsyncpa [#allocation3], 1 }
 0x307   :  { %613 = vsyncpa [#allocation6], 1 }
 0x308   :  { %614 = vsyncpa [#allocation9], 1 }
 0x309   :  { %615 = vsyncpa [#allocation4], 1 }

</bundles_post_ra>
